<compile_context>
chip_gen: v5e
topology: v5e:2x2
jax: 0.10.0
libtpu: 0.0.40
codegen_flags: <defaults>
</compile_context>

<pallas_src>
import functools

import jax
import jax.numpy as jnp
from jax.experimental import pallas as pl
from jax.experimental.pallas import tpu as pltpu

HIDDEN = 64          # logical hidden width of the PyTorch module
LANE = 128           # TPU lane width; everything is padded to a multiple of this
NEG_INF = -1e30      # f32 bias for padded logit lanes so exp() -> 0


def _round_up(x, m):
    return (x + m - 1) // m * m


def actor_mlp_kernel(x_ref, w1_ref, b1_ref, w2_ref, b2_ref, w3_ref, b3_ref, o_ref):
    """Fused 3-layer MLP + softmax on one (TILE_B, ...) batch tile.

    Refs (all VMEM):
      x_ref : (TILE_B, state_dim)    f32
      w1_ref: (state_dim, 128)       bf16   b1_ref: (1, 128) f32
      w2_ref: (128, 128)             bf16   b2_ref: (1, 128) f32
      w3_ref: (128, 128)             bf16   b3_ref: (1, 128) f32 (padded cols = -1e30)
      o_ref : (TILE_B, 128)          bf16
    """
    x = x_ref[...].astype(jnp.bfloat16)

    # fc1 + tanh  (bf16 MXU inputs, f32 accumulate, f32 elementwise)
    h1 = jnp.dot(x, w1_ref[...], preferred_element_type=jnp.float32) + b1_ref[...]
    h1 = jnp.tanh(h1)

    # fc2 + tanh
    h2 = jnp.dot(h1.astype(jnp.bfloat16), w2_ref[...],
                 preferred_element_type=jnp.float32) + b2_ref[...]
    h2 = jnp.tanh(h2)

    # fc3 (padded logit columns carry -1e30 bias, everything f32 from here on)
    z3 = jnp.dot(h2.astype(jnp.bfloat16), w3_ref[...],
                 preferred_element_type=jnp.float32) + b3_ref[...]

    # numerically stable softmax over the (padded) lane axis, exact normalization
    z3 = z3 - jnp.max(z3, axis=-1, keepdims=True)
    e = jnp.exp(z3)                                   # padded lanes -> exp(-1e30) = 0
    denom = jnp.sum(e, axis=-1, keepdims=True)        # >= 1 (max element is exp(0))
    p = e / denom                                     # exact: rows sum to 1 in f32
    o_ref[...] = p.astype(o_ref.dtype)                # bf16 store, lane-dense


def init_actor_params(key, state_dim, action_dim, hidden=HIDDEN):
    """PyTorch-style Linear parameters: weight (out, in), bias (out,)."""
    ks = jax.random.split(key, 6)

    def lin(kw, kb, fan_in, fan_out):
        bound = 1.0 / jnp.sqrt(fan_in)
        w = jax.random.uniform(kw, (fan_out, fan_in), jnp.float32, -bound, bound)
        b = jax.random.uniform(kb, (fan_out,), jnp.float32, -bound, bound)
        return w, b

    return (lin(ks[0], ks[1], state_dim, hidden),
            lin(ks[2], ks[3], hidden, hidden),
            lin(ks[4], ks[5], hidden, action_dim))


def prepare_actor_params(torch_params):
    """Transpose to [in, out], pad to lane-dense widths, cast matmul weights to bf16."""
    (w1, b1), (w2, b2), (w3, b3) = torch_params
    state_dim = w1.shape[1]
    action_dim = w3.shape[0]
    h_pad = _round_up(HIDDEN, LANE)          # 128
    a_pad = _round_up(action_dim, LANE)      # 128

    w1p = jnp.zeros((state_dim, h_pad), jnp.float32).at[:, :HIDDEN].set(w1.T)
    b1p = jnp.zeros((1, h_pad), jnp.float32).at[0, :HIDDEN].set(b1)

    w2p = jnp.zeros((h_pad, h_pad), jnp.float32).at[:HIDDEN, :HIDDEN].set(w2.T)
    b2p = jnp.zeros((1, h_pad), jnp.float32).at[0, :HIDDEN].set(b2)

    w3p = jnp.zeros((h_pad, a_pad), jnp.float32).at[:HIDDEN, :action_dim].set(w3.T)
    # padded logit columns get a huge negative f32 bias -> excluded from softmax
    b3p = jnp.full((1, a_pad), NEG_INF, jnp.float32).at[0, :action_dim].set(b3)

    packed = (w1p.astype(jnp.bfloat16), b1p,
              w2p.astype(jnp.bfloat16), b2p,
              w3p.astype(jnp.bfloat16), b3p)
    return packed, action_dim, a_pad


@functools.partial(jax.jit, static_argnames=("action_dim", "a_pad", "tile_b"))
def actor_forward(state, packed, *, action_dim, a_pad, tile_b=1024):
    """Fused Actor forward over the whole batch with a 1-D batch grid.

    tile_b=1024 fits comfortably in the default scoped VMEM on v5e/v6e/v7x;
    don't raise it past ~2048 on v5e without also raising vmem_limit_bytes.
    """
    w1, b1, w2, b2, w3, b3 = packed
    B, state_dim = state.shape

    # Largest batch tile <= tile_b that still yields >= 2 grid steps when B is
    # big enough (so dimension_semantics=("parallel",) actually splits work
    # across v7x's two TensorCores).  No jnp.pad: Pallas clips the ragged last
    # block itself, and garbage tail rows are never written back.
    tb = max(8, min(tile_b, _round_up(pl.cdiv(B, 2), 8)))
    grid = (pl.cdiv(B, tb),)

    pinned = lambda shp: pl.BlockSpec(shp, lambda i: (0,) * len(shp))

    out = pl.pallas_call(
        actor_mlp_kernel,
        out_shape=jax.ShapeDtypeStruct((B, a_pad), jnp.bfloat16),
        grid=grid,
        in_specs=[
            pl.BlockSpec((tb, state_dim), lambda i: (i, 0)),   # moving batch tile
            pinned(w1.shape), pinned(b1.shape),                # weights resident in VMEM
            pinned(w2.shape), pinned(b2.shape),
            pinned(w3.shape), pinned(b3.shape),
        ],
        out_specs=pl.BlockSpec((tb, a_pad), lambda i: (i, 0)),
        compiler_params=pltpu.CompilerParams(
            dimension_semantics=("parallel",)),                # v7x: shard over 2 TCs
    )(state, w1, b1, w2, b2, w3, b3)

    # Slice off padded logit lanes; cast back to f32 to match PyTorch semantics.
    return out[:, :action_dim].astype(jnp.float32)


def actor_forward_ref(state, torch_params):
    """Pure-JAX f32 reference (mirrors the PyTorch forward)."""
    (w1, b1), (w2, b2), (w3, b3) = torch_params
    h1 = jnp.tanh(state @ w1.T + b1)
    h2 = jnp.tanh(h1 @ w2.T + b2)
    z3 = h2 @ w3.T + b3
    return jax.nn.softmax(z3, axis=-1)


# TODO(synk): the `Reshape` helper class mixes numpy with external agent objects
# (`source_policy`, `choose_action`) and is not exercised by Actor.forward; it has
# no Pallas equivalent and is omitted.


if __name__ == "__main__":
    key = jax.random.PRNGKey(0)
    k_params, k_state, k_state2 = jax.random.split(key, 3)

    batch, state_dim, action_dim = 8, 32, 8

    torch_params = init_actor_params(k_params, state_dim, action_dim)
    packed, a_dim, a_pad = prepare_actor_params(torch_params)

    # ---- small batch (single grid step) ----
    state = jax.random.normal(k_state, (batch, state_dim), jnp.float32)
    out = jax.block_until_ready(
        actor_forward(state, packed, action_dim=a_dim, a_pad=a_pad))
    assert out.shape == (batch, action_dim)

    # softmax rows sum to ~1 (f32-exact normalization; only bf16 output rounding)
    row_sums = jnp.sum(out, axis=-1)
    assert jnp.allclose(row_sums, jnp.ones_like(row_sums), atol=5e-3)

    # matches the f32 reference within bf16-matmul / bf16-output tolerance
    ref = actor_forward_ref(state, torch_params)
    assert jnp.allclose(out, ref, atol=2e-2)

    # ---- larger, non-tile-aligned batch (multi-step grid, ragged last block) ----
    big_batch = 300
    state2 = jax.random.normal(k_state2, (big_batch, state_dim), jnp.float32)
    out2 = jax.block_until_ready(
        actor_forward(state2, packed, action_dim=a_dim, a_pad=a_pad))
    assert out2.shape == (big_batch, action_dim)

    row_sums2 = jnp.sum(out2, axis=-1)
    assert jnp.allclose(row_sums2, jnp.ones_like(row_sums2), atol=5e-3)
    ref2 = actor_forward_ref(state2, torch_params)
    assert jnp.allclose(out2, ref2, atol=2e-2)

    print("KERNEL_OK")
</pallas_src>

<mosaic_0001>
module attributes {stable_mosaic.version = 11 : i64} {
  func.func @actor_mlp_kernel(%arg0: i32, %arg1: memref<8x32xf32, #tpu.memory_space<vmem>>, %arg2: memref<32x128xbf16, #tpu.memory_space<vmem>>, %arg3: memref<1x128xf32, #tpu.memory_space<vmem>>, %arg4: memref<128x128xbf16, #tpu.memory_space<vmem>>, %arg5: memref<1x128xf32, #tpu.memory_space<vmem>>, %arg6: memref<128x128xbf16, #tpu.memory_space<vmem>>, %arg7: memref<1x128xf32, #tpu.memory_space<vmem>>, %arg8: memref<8x128xbf16, #tpu.memory_space<vmem>>) attributes {dimension_semantics = [#tpu.dimension_semantics<parallel>], iteration_bounds = array<i64: 1>, scalar_prefetch = 0 : i64, scratch_operands = 0 : i64, tpu.core_type = #tpu.core_type<tc>, window_params = [{transform_indices = @transform_0, window_bounds = array<i64: 8, 32>}, {pipeline_mode = #tpu.pipeline_mode<synchronous>, transform_indices = @transform_1, window_bounds = array<i64: 32, 128>}, {pipeline_mode = #tpu.pipeline_mode<synchronous>, transform_indices = @transform_2, window_bounds = array<i64: 1, 128>}, {pipeline_mode = #tpu.pipeline_mode<synchronous>, transform_indices = @transform_3, window_bounds = array<i64: 128, 128>}, {pipeline_mode = #tpu.pipeline_mode<synchronous>, transform_indices = @transform_4, window_bounds = array<i64: 1, 128>}, {pipeline_mode = #tpu.pipeline_mode<synchronous>, transform_indices = @transform_5, window_bounds = array<i64: 128, 128>}, {pipeline_mode = #tpu.pipeline_mode<synchronous>, transform_indices = @transform_6, window_bounds = array<i64: 1, 128>}, {transform_indices = @transform_7, window_bounds = array<i64: 8, 128>}]} {
    %c0 = arith.constant 0 : index
    %c0_0 = arith.constant 0 : index
    %0 = vector.load %arg1[%c0, %c0_0] : memref<8x32xf32, #tpu.memory_space<vmem>>, vector<8x32xf32>
    %1 = arith.truncf %0 : vector<8x32xf32> to vector<8x32xbf16>
    %c0_1 = arith.constant 0 : index
    %c0_2 = arith.constant 0 : index
    %2 = vector.load %arg2[%c0_1, %c0_2] : memref<32x128xbf16, #tpu.memory_space<vmem>>, vector<32x128xbf16>
    %cst = arith.constant dense<0.000000e+00> : vector<8x128xf32>
    %3 = tpu.matmul %1, %2, %cst {dimension_numbers = #tpu.dot_dimension_numbers<[1], [0], [0], [1], [0, 0, 1, 1], [], []>} : vector<8x32xbf16>, vector<32x128xbf16>, vector<8x128xf32> -> vector<8x128xf32>
    %c0_3 = arith.constant 0 : index
    %c0_4 = arith.constant 0 : index
    %4 = vector.load %arg3[%c0_3, %c0_4] : memref<1x128xf32, #tpu.memory_space<vmem>>, vector<1x128xf32>
    %5 = vector.broadcast %4 : vector<1x128xf32> to vector<8x128xf32>
    %6 = arith.addf %3, %5 : vector<8x128xf32>
    %7 = math.tanh %6 : vector<8x128xf32>
    %8 = arith.truncf %7 : vector<8x128xf32> to vector<8x128xbf16>
    %c0_5 = arith.constant 0 : index
    %c0_6 = arith.constant 0 : index
    %9 = vector.load %arg4[%c0_5, %c0_6] : memref<128x128xbf16, #tpu.memory_space<vmem>>, vector<128x128xbf16>
    %cst_7 = arith.constant dense<0.000000e+00> : vector<8x128xf32>
    %10 = tpu.matmul %8, %9, %cst_7 {dimension_numbers = #tpu.dot_dimension_numbers<[1], [0], [0], [1], [0, 0, 1, 1], [], []>} : vector<8x128xbf16>, vector<128x128xbf16>, vector<8x128xf32> -> vector<8x128xf32>
    %c0_8 = arith.constant 0 : index
    %c0_9 = arith.constant 0 : index
    %11 = vector.load %arg5[%c0_8, %c0_9] : memref<1x128xf32, #tpu.memory_space<vmem>>, vector<1x128xf32>
    %12 = vector.broadcast %11 : vector<1x128xf32> to vector<8x128xf32>
    %13 = arith.addf %10, %12 : vector<8x128xf32>
    %14 = math.tanh %13 : vector<8x128xf32>
    %15 = arith.truncf %14 : vector<8x128xf32> to vector<8x128xbf16>
    %c0_10 = arith.constant 0 : index
    %c0_11 = arith.constant 0 : index
    %16 = vector.load %arg6[%c0_10, %c0_11] : memref<128x128xbf16, #tpu.memory_space<vmem>>, vector<128x128xbf16>
    %cst_12 = arith.constant dense<0.000000e+00> : vector<8x128xf32>
    %17 = tpu.matmul %15, %16, %cst_12 {dimension_numbers = #tpu.dot_dimension_numbers<[1], [0], [0], [1], [0, 0, 1, 1], [], []>} : vector<8x128xbf16>, vector<128x128xbf16>, vector<8x128xf32> -> vector<8x128xf32>
    %c0_13 = arith.constant 0 : index
    %c0_14 = arith.constant 0 : index
    %18 = vector.load %arg7[%c0_13, %c0_14] : memref<1x128xf32, #tpu.memory_space<vmem>>, vector<1x128xf32>
    %19 = vector.broadcast %18 : vector<1x128xf32> to vector<8x128xf32>
    %20 = arith.addf %17, %19 : vector<8x128xf32>
    %cst_15 = arith.constant dense<0xFF800000> : vector<8xf32>
    %21 = vector.multi_reduction <maximumf>, %20, %cst_15 [1] : vector<8x128xf32> to vector<8xf32>
    %22 = vector.shape_cast %21 : vector<8xf32> to vector<8x1xf32>
    %23 = vector.broadcast %22 : vector<8x1xf32> to vector<8x128xf32>
    %24 = arith.subf %20, %23 : vector<8x128xf32>
    %25 = math.exp %24 : vector<8x128xf32>
    %cst_16 = arith.constant dense<0.000000e+00> : vector<8xf32>
    %26 = vector.multi_reduction <add>, %25, %cst_16 [1] : vector<8x128xf32> to vector<8xf32>
    %27 = vector.shape_cast %26 : vector<8xf32> to vector<8x1xf32>
    %28 = vector.broadcast %27 : vector<8x1xf32> to vector<8x128xf32>
    %29 = arith.divf %25, %28 : vector<8x128xf32>
    %30 = arith.truncf %29 : vector<8x128xf32> to vector<8x128xbf16>
    %c0_17 = arith.constant 0 : index
    %c0_18 = arith.constant 0 : index
    %31 = vector.load %arg8[%c0_17, %c0_18] : memref<8x128xbf16, #tpu.memory_space<vmem>>, vector<8x128xbf16>
    tpu.vector_store %arg8[%c0_17, %c0_18], %30 {strides = array<i32>} : memref<8x128xbf16, #tpu.memory_space<vmem>>, vector<8x128xbf16>,
    return
  }
  func.func @transform_0(%arg0: i32) -> (i32, i32) {
    %c0_i32 = arith.constant 0 : i32
    %c0_i32_0 = arith.constant 0 : i32
    return %arg0, %c0_i32 : i32, i32
  }
  func.func @transform_1(%arg0: i32) -> (i32, i32) {
    %c0_i32 = arith.constant 0 : i32
    %c0_i32_0 = arith.constant 0 : i32
    %c0_i32_1 = arith.constant 0 : i32
    return %c0_i32, %c0_i32_0 : i32, i32
  }
  func.func @transform_2(%arg0: i32) -> (i32, i32) {
    %c0_i32 = arith.constant 0 : i32
    %c0_i32_0 = arith.constant 0 : i32
    %c0_i32_1 = arith.constant 0 : i32
    return %c0_i32, %c0_i32_0 : i32, i32
  }
  func.func @transform_3(%arg0: i32) -> (i32, i32) {
    %c0_i32 = arith.constant 0 : i32
    %c0_i32_0 = arith.constant 0 : i32
    %c0_i32_1 = arith.constant 0 : i32
    return %c0_i32, %c0_i32_0 : i32, i32
  }
  func.func @transform_4(%arg0: i32) -> (i32, i32) {
    %c0_i32 = arith.constant 0 : i32
    %c0_i32_0 = arith.constant 0 : i32
    %c0_i32_1 = arith.constant 0 : i32
    return %c0_i32, %c0_i32_0 : i32, i32
  }
  func.func @transform_5(%arg0: i32) -> (i32, i32) {
    %c0_i32 = arith.constant 0 : i32
    %c0_i32_0 = arith.constant 0 : i32
    %c0_i32_1 = arith.constant 0 : i32
    return %c0_i32, %c0_i32_0 : i32, i32
  }
  func.func @transform_6(%arg0: i32) -> (i32, i32) {
    %c0_i32 = arith.constant 0 : i32
    %c0_i32_0 = arith.constant 0 : i32
    %c0_i32_1 = arith.constant 0 : i32
    return %c0_i32, %c0_i32_0 : i32, i32
  }
  func.func @transform_7(%arg0: i32) -> (i32, i32) {
    %c0_i32 = arith.constant 0 : i32
    %c0_i32_0 = arith.constant 0 : i32
    return %arg0, %c0_i32 : i32, i32
  }
}

</mosaic_0001>

<bundles_post_ra>
// kernel: actor_forward.1
= control target key start
LH: loop header
LB: loop body
LE: loop exit
PB: predicated region body
PF: predicated region fallthrough
CT: control target
= control target key end

     0   :  { %12 = vsyncpa [#allocation3], 0  ;;  %s604_s0 = inlined_call_operand.hbm [shape: f32[8,32], index: 0, kind: input, shape index: {}]   ;;  %s605_s1 = inlined_call_operand.hbm [shape: bf16[32,128], index: 1, kind: input, shape index: {}]   ;;  %s606_s2 = inlined_call_operand.vmem [shape: f32[1,128], index: 2, kind: input, shape index: {}]   ;;  %s607_s3 = inlined_call_operand.hbm [shape: bf16[128,128], index: 3, kind: input, shape index: {}]   ;;  %s608_s4 = inlined_call_operand.vmem [shape: f32[1,128], index: 4, kind: input, shape index: {}]   ;;  %s609_s5 = inlined_call_operand.hbm [shape: bf16[128,128], index: 5, kind: input, shape index: {}]   ;;  %s610_s6 = inlined_call_operand.vmem [shape: f32[1,128], index: 6, kind: input, shape index: {}]   ;;  %s611_s7 = inlined_call_operand.vmem [shape: bf16[8,128], index: 7, kind: output, shape index: {}]  }
   0x1   :  { %13 = vsyncpa [#allocation5], 0  ;;  %s30_s26 = sshll.u32 %s605_s1, 4  ;;  %s31_s26 = int_to_ptr.hbm [resolvable:$true] %s30_s26 }
   0x2   :  { %14 = vsyncpa [#allocation8], 0  ;;  %s534_s27 = smov [#allocation4]   ;;  %s20_s8 = sshll.u32 %s604_s0, 4  ;;  %s21_s8 = int_to_ptr.hbm [resolvable:$true] %s20_s8 }
   0x3   :  { %s32_s28 = sshll.u32 %s534_s27, 4  ;;  %s535_s9 = smov 64   ;;  %s33_s28 = int_to_ptr.vmem [resolvable:$true] %s32_s28 }
   0x4   :  { %s536_s10 = smov 4   ;;  %s537_s11 = smov [#allocation2]  }
   0x5   :  { %38 = dma.hbm_to_vmem [thread:$0]  %s31_s26, 256, %s33_s28, [#allocation5], %s535_s9, %s535_s9, %s536_s10  }
   0x6   :  { %s22_s12 = sshll.u32 %s537_s11, 4  ;;  %s45_s15 = sshll.u32 %s607_s3, 4  ;;  %s23_s12 = int_to_ptr.vmem [resolvable:$true] %s22_s12  ;;  %s46_s15 = int_to_ptr.hbm [resolvable:$true] %s45_s15 }
   0x7   :  { %25 = dma.hbm_to_vmem [thread:$0]  %s21_s8, 128, %s23_s12, [#allocation3]  }
   0x8   :  { %s60_s17 = sshll.u32 %s609_s5, 4  ;;  %s538_s18 = smov [#allocation6]   ;;  %s61_s17 = int_to_ptr.hbm [resolvable:$true] %s60_s17 }
   0x9   :  { %s47_s19 = sshll.u32 %s538_s18, 4  ;;  %s539_s0 = smov [#allocation7]   ;;  %s48_s19 = int_to_ptr.vmem [resolvable:$true] %s47_s19 }
   0xa   :  { %53 = dma.hbm_to_vmem [thread:$0]  %s46_s15, 1024, %s48_s19, [#allocation5], %s535_s9, %s535_s9, %s536_s10  }
   0xb   :  { %s62_s20 = sshll.u32 %s539_s0, 4  ;;  %s63_s20 = int_to_ptr.vmem [resolvable:$true] %s62_s20 }
   0xc   :  { %68 = dma.hbm_to_vmem [thread:$0]  %s61_s17, 1024, %s63_s20, [#allocation8], %s535_s9, %s535_s9, %s536_s10  }
   0xd   :  { %528 = dma.done.wait [#allocation3], 128  }
   0xe   :  { %529 = vsyncadd [#allocation3], 4294967168 }
   0xf   :  { %530 = dma.done.wait [#allocation5], 1280  }
  0x10   :  { %531 = vsyncadd [#allocation5], 4294966016 }
  0x11   :  { %532 = dma.done.wait [#allocation8], 1024  }
  0x12   :  { %533 = vsyncadd [#allocation8], 4294966272  ;;  %v398_v0 = vld [vmem:[#allocation4 + $0x8] sm:$0xff]  ;;  %v397_v2 = vld [vmem:[#allocation4] sm:$0xff]  ;;  %vm110_vm0 = vcmask 261120  }
  0x13   :  { %v406_v1 = vld [vmem:[#allocation6 + $0x38] sm:$0xff]  ;;  %120 = vmatpush.bf16.msra.mxu0 %v398_v0  ;;  %v88_v3 = vld [vmem:[#allocation2] sm:$0xff]  ;;  %v405_v4 = vld [vmem:[#allocation6 + $0x30] sm:$0xff] }
  0x14   :  { %197 = vmatpush.bf16.msra.mxu1 %v406_v1  ;;  %v89_v5 = vpack.c.bf16 %v88_v3, %v88_v3  ;;  %v404_v6 = vld [vmem:[#allocation6 + $0x28] sm:$0xff]  ;;  %v403_v7 = vld [vmem:[#allocation6 + $0x20] sm:$0xff]  ;;  %v402_v8 = vld [vmem:[#allocation6 + $0x18] sm:$0xff] }
  0x15   :  { %v401_v9 = vld [vmem:[#allocation6 + $0x10] sm:$0xff]  ;;  %v400_v10 = vld [vmem:[#allocation6 + $0x8] sm:$0xff]  ;;  %v399_v11 = vld [vmem:[#allocation6] sm:$0xff] }
  0x16   :  { %v414_v12 = vld [vmem:[#allocation7 + $0x38] sm:$0xff]  ;;  %v413_v13 = vld [vmem:[#allocation7 + $0x30] sm:$0xff]  ;;  %v412_v14 = vld [vmem:[#allocation7 + $0x28] sm:$0xff] }
  0x17   :  { %121 = vmatpush.bf16.msra.mxu0 %v397_v2  ;;  %280 = vmatpush.bf16.msra.mxu2 %v414_v12  ;;  %v411_v15 = vld [vmem:[#allocation7 + $0x20] sm:$0xff]  ;;  %v410_v16 = vld [vmem:[#allocation7 + $0x18] sm:$0xff]  ;;  %v421_v17 = vld [vmem:[%s606_s2] ss:$0 sm:$0xff] }
  0x18   :  { %198 = vmatpush.bf16.msra.mxu1 %v405_v4  ;;  %v409_v23 = vld [vmem:[#allocation7 + $0x10] sm:$0xff]  ;;  %v408_v24 = vld [vmem:[#allocation7 + $0x8] sm:$0xff]  ;;  %v407_v25 = vld [vmem:[#allocation7] sm:$0xff] }
  0x19   :  { %v422_v26 = vld [vmem:[%s608_s4] ss:$0 sm:$0xff] }
  0x1a   :  { %332 = vmatmul.msk.bf16.vlgmr.msra.gmra.mxu0 %vm110_vm0, %v89_v5  ;;  %v423_v32 = vld [vmem:[%s610_s6] ss:$0 sm:$0xff] }
  0x1b   :  { %281 = vmatpush.bf16.msra.mxu2 %v413_v13 }
  0x1c   :  { %199 = vmatpush.bf16.msra.mxu1 %v404_v6 }
  0x1f   :  { %282 = vmatpush.bf16.msra.mxu2 %v412_v14 }
  0x20   :  { %200 = vmatpush.bf16.msra.mxu1 %v403_v7 }
  0x23   :  { %283 = vmatpush.bf16.msra.mxu2 %v411_v15 }
  0x24   :  { %201 = vmatpush.bf16.msra.mxu1 %v402_v8 }
  0x27   :  { %284 = vmatpush.bf16.msra.mxu2 %v410_v16 }
  0x28   :  { %202 = vmatpush.bf16.msra.mxu1 %v401_v9 }
  0x2b   :  { %285 = vmatpush.bf16.msra.mxu2 %v409_v23 }
  0x2c   :  { %203 = vmatpush.bf16.msra.mxu1 %v400_v10 }
  0x2f   :  { %286 = vmatpush.bf16.msra.mxu2 %v408_v24 }
  0x30   :  { %204 = vmatpush.bf16.msra.mxu1 %v399_v11 }
  0x33   :  { %287 = vmatpush.bf16.msra.mxu2 %v407_v25 }
  0x97   :  { %v123_v18 = vpop.f32.mrf.mxu0 }
  0x98   :  { %v124_v19 = vadd.f32 %v421_v17, %v123_v18 }
  0x9a   :  { %424 = vtanh.f32 %v124_v19 }
  0x9f   :  { %v125_v20 = vpop.f32.mrf.mxu0 }
  0xa0   :  { %v425_v21 = vpop.eup %424 }
  0xa1   :  { %v128_v22 = vpack.c.bf16 %v425_v21, %v425_v21 }
  0xa3   :  { %205 = vmatmul.bf16.vlgmr.msra.gmra.mxu1 %v128_v22 }
 0x120   :  { %v206_v27 = vpop.f32.mrf.mxu1 }
 0x121   :  { %v207_v28 = vadd.f32 %v422_v26, %v206_v27 }
 0x123   :  { %426 = vtanh.f32 %v207_v28 }
 0x128   :  { %v208_v29 = vpop.f32.mrf.mxu1 }
 0x129   :  { %v427_v30 = vpop.eup %426 }
 0x12a   :  { %v211_v31 = vpack.c.bf16 %v427_v30, %v427_v30 }
 0x12c   :  { %288 = vmatmul.bf16.vlgmr.msra.gmra.mxu2 %v211_v31 }
 0x1af   :  { %v289_v33 = vpop.f32.mrf.mxu2 }
 0x1b0   :  { %v290_v34 = vadd.f32 %v423_v32, %v289_v33 }
 0x1b2   :  { %293 = vmax.xlane.f32.xlu0 %v290_v34 }
 0x1b7   :  { %v291_v35 = vpop.f32.mrf.mxu2 }
 0x225   :  { %v294_v36 = vpop.xlane.xlu0 %293 }
 0x226   :  { %v295_v37 = vsub.f32 %v290_v34, %v294_v36 }
 0x228   :  { %v296_v38 = vmul.f32 1.442695, %v295_v37 }
 0x22a   :  { %428 = vpow2.f32 %v296_v38 }
 0x230   :  { %v429_v39 = vpop.eup %428 }
 0x231   :  { %298 = vadd.xlane.f32.xlu0 %v429_v39 }
 0x2a4   :  { %v299_v40 = vpop.xlane.xlu0 %298 }
 0x2a5   :  { %430 = vrcp.f32 %v299_v40  ;;  %v311_v44 = vand.u32 2147483648, %v299_v40  ;;  %v309_v46 = vand.u32 2147483647, %v299_v40  ;;  %vm305_vm2 = vweird.f32 %v299_v40 }
 0x2a7   :  { %v312_v48 = vor.u32 1.1754944e-38, %v311_v44  ;;  %vm310_vm4 = vcmp.eq.f32.partialorder %v309_v46, 8.507059e+37 }
 0x2ab   :  { %v431_v41 = vpop.eup %430 }
 0x2ac   :  { %v301_v42 = vmul.f32 %v431_v41, %v299_v40  ;;  %vm306_vm1 = vweird.f32 %v431_v41 }
 0x2ad   :  { %vm307_vm3 = vmor %vm305_vm2, %vm306_vm1 }
 0x2ae   :  { %v302_v43 = vsub.f32 1.0, %v301_v42 }
 0x2b0   :  { %v303_v45 = vmul.f32 %v431_v41, %v302_v43 }
 0x2b2   :  { %v304_v47 = vadd.f32 %v431_v41, %v303_v45 }
 0x2b4   :  { %v308_v49 = vsel %vm307_vm3, %v431_v41, %v304_v47 }
 0x2b5   :  { %v313_v50 = vsel %vm310_vm4, %v312_v48, %v308_v49 }
 0x2b6   :  { %v314_v51 = vmul.f32 %v429_v39, %v313_v50 }
 0x2b8   :  { %v315_v52 = vpack.c.bf16 %v314_v51, %v314_v51 }
 0x2ba   :  { %316 = vst [vmem:[%s611_s7] sm:$0xf] %v315_v52 }
 0x2bb   :  { %321 = vsyncpa [#allocation3], 1 }
 0x2bc   :  { %322 = vsyncpa [#allocation5], 1 }
 0x2bd   :  { %323 = vsyncpa [#allocation8], 1 }

</bundles_post_ra>
